<compile_context>
chip_gen: v5e
topology: v5e:2x2
jax: 0.10.0
libtpu: 0.0.40
codegen_flags: <defaults>
</compile_context>

<pallas_src>
import math
import jax
import jax.numpy as jnp
from jax.experimental import pallas as pl
from jax.experimental.pallas import tpu as pltpu


def adv_net_kernel(x_ref, w1_ref, b1_ref, w2_ref, b2_ref, w3_ref, b3_ref, o_ref):
    # Layer 1: Linear(in_feature -> hidden) on MXU (bf16 in, f32 acc) + ReLU.
    h1 = jnp.dot(x_ref[...], w1_ref[...], preferred_element_type=jnp.float32)
    h1 = jnp.maximum(h1 + b1_ref[...], 0.0)

    # TODO(synk): dropout1/dropout2 and the gradient-reversal hook are
    # training-only (stochastic / backward-only); this is the eval forward.

    # Layer 2: Linear(hidden -> hidden) + ReLU.
    h2 = jnp.dot(h1.astype(jnp.bfloat16), w2_ref[...],
                 preferred_element_type=jnp.float32)
    h2 = jnp.maximum(h2 + b2_ref[...], 0.0)

    # Layer 3: Linear(hidden -> 1) + Sigmoid.
    # N=1 output: VPU multiply + lane reduction (XLU) instead of a 1-column
    # MXU matmul; w3 is a (1, H) f32 row, b3 is an SMEM scalar.
    y = jnp.sum(h2 * w3_ref[...], axis=-1, keepdims=True) + b3_ref[0]
    o_ref[...] = jax.nn.sigmoid(y).astype(o_ref.dtype)


def adversarial_network_forward(x, params, *, tb=256):
    """x: [B, in_feature] float32. params: dict (bf16 weights, f32 biases)."""
    B, in_feature = x.shape
    hidden = params["w1"].shape[1]

    w1, b1, w2, b2, w3, b3 = (params["w1"], params["b1"], params["w2"],
                              params["b2"], params["w3"], params["b3"])

    # bf16 matmul inputs (accumulation stays f32 inside the kernel).
    x_bf16 = x.astype(jnp.bfloat16)

    # Pad the batch so every grid step sees a full TB-row tile; strip at the end.
    b_pad = pl.cdiv(B, tb) * tb
    if b_pad != B:
        x_bf16 = jnp.pad(x_bf16, ((0, b_pad - B), (0, 0)))
    grid = (b_pad // tb,)

    const2 = lambda i: (0, 0)
    in_specs = [
        pl.BlockSpec((tb, in_feature), lambda i: (i, 0)),       # x tile (pipelined)
        pl.BlockSpec((in_feature, hidden), const2),             # w1 (resident)
        pl.BlockSpec((1, hidden), const2),                      # b1
        pl.BlockSpec((hidden, hidden), const2),                 # w2 (resident)
        pl.BlockSpec((1, hidden), const2),                      # b2
        pl.BlockSpec((1, hidden), const2),                      # w3 row
        pl.BlockSpec(memory_space=pltpu.MemorySpace.SMEM),      # b3 scalar
    ]
    out_spec = pl.BlockSpec((tb, 1), lambda i: (i, 0))

    # VMEM budget: resident bf16 weights + biases, double-buffered x/out tiles,
    # f32 activation tiles; 2x headroom + 4 MiB, capped well under v7x physical.
    resident = (in_feature * hidden + hidden * hidden) * 2 + 3 * hidden * 4
    streamed = 2 * (tb * in_feature * 2 + tb * 4)
    activ = 2 * tb * hidden * 4
    vmem_bytes = int(min(2 * (resident + streamed + activ) + (4 << 20), 48 << 20))

    y = pl.pallas_call(
        adv_net_kernel,
        out_shape=jax.ShapeDtypeStruct((b_pad, 1), jnp.float32),
        grid=grid,
        in_specs=in_specs,
        out_specs=out_spec,
        compiler_params=pltpu.CompilerParams(
            dimension_semantics=("parallel",),
            vmem_limit_bytes=vmem_bytes,
        ),
    )(x_bf16, w1, b1, w2, b2, w3, b3)
    return y[:B]


def init_params(key, in_feature, hidden_size):
    """Mirrors init_weights(): Xavier-normal weights, zero biases.
    w1/w2 stored transposed ([in, out]) in bf16; w3 stored as a (1, H) f32 row."""
    k1, k2, k3 = jax.random.split(key, 3)

    def xavier_normal(k, fan_in, fan_out):
        std = math.sqrt(2.0 / (fan_in + fan_out))
        # torch weight is (out, in); generate that, then transpose to (in, out).
        w = std * jax.random.normal(k, (fan_out, fan_in), dtype=jnp.float32)
        return w.T

    return {
        "w1": xavier_normal(k1, in_feature, hidden_size).astype(jnp.bfloat16),
        "b1": jnp.zeros((1, hidden_size), jnp.float32),
        "w2": xavier_normal(k2, hidden_size, hidden_size).astype(jnp.bfloat16),
        "b2": jnp.zeros((1, hidden_size), jnp.float32),
        # torch ad_layer3.weight is (1, hidden) -> keep that row layout, f32.
        "w3": xavier_normal(k3, hidden_size, 1).T.astype(jnp.float32),
        "b3": jnp.zeros((1,), jnp.float32),
    }


if __name__ == "__main__":
    # Small but MXU-friendly demo shapes; B not a multiple of the tile to
    # exercise the padding path, tb=128 so the grid has >1 step.
    B, IN_FEATURE, HIDDEN, TB = 300, 128, 128, 128

    key = jax.random.PRNGKey(0)
    kx, kp = jax.random.split(key)
    x = jax.random.normal(kx, (B, IN_FEATURE), dtype=jnp.float32)
    params = init_params(kp, IN_FEATURE, HIDDEN)

    y = adversarial_network_forward(x, params, tb=TB)
    y = jax.block_until_ready(y)

    # Reference check in plain JAX (eval-mode forward, bf16 matmul inputs,
    # f32 accumulation — same numerics as the kernel up to bf16 rounding).
    w1 = params["w1"].astype(jnp.float32)
    w2 = params["w2"].astype(jnp.float32)
    h1 = jnp.maximum(x @ w1 + params["b1"], 0.0)
    h2 = jnp.maximum(h1 @ w2 + params["b2"], 0.0)
    y_ref = jax.nn.sigmoid(h2 @ params["w3"].T + params["b3"])

    assert y.shape == (B, 1)
    assert jnp.allclose(y, y_ref, atol=2e-2), "mismatch vs reference"

    print("KERNEL_OK")
</pallas_src>

<mosaic_0001>
module attributes {stable_mosaic.version = 11 : i64} {
  func.func @adv_net_kernel(%arg0: i32, %arg1: memref<128x128xbf16, #tpu.memory_space<vmem>>, %arg2: memref<128x128xbf16, #tpu.memory_space<vmem>>, %arg3: memref<1x128xf32, #tpu.memory_space<vmem>>, %arg4: memref<128x128xbf16, #tpu.memory_space<vmem>>, %arg5: memref<1x128xf32, #tpu.memory_space<vmem>>, %arg6: memref<1x128xf32, #tpu.memory_space<vmem>>, %arg7: memref<1xf32, #tpu.memory_space<smem>>, %arg8: memref<128x1xf32, #tpu.memory_space<vmem>>) attributes {dimension_semantics = [#tpu.dimension_semantics<parallel>], iteration_bounds = array<i64: 3>, scalar_prefetch = 0 : i64, scratch_operands = 0 : i64, tpu.core_type = #tpu.core_type<tc>, window_params = [{transform_indices = @transform_0, window_bounds = array<i64: 128, 128>}, {pipeline_mode = #tpu.pipeline_mode<synchronous>, transform_indices = @transform_1, window_bounds = array<i64: 128, 128>}, {pipeline_mode = #tpu.pipeline_mode<synchronous>, transform_indices = @transform_2, window_bounds = array<i64: 1, 128>}, {pipeline_mode = #tpu.pipeline_mode<synchronous>, transform_indices = @transform_3, window_bounds = array<i64: 128, 128>}, {pipeline_mode = #tpu.pipeline_mode<synchronous>, transform_indices = @transform_4, window_bounds = array<i64: 1, 128>}, {pipeline_mode = #tpu.pipeline_mode<synchronous>, transform_indices = @transform_5, window_bounds = array<i64: 1, 128>}, {transform_indices = @transform_6, window_bounds = array<i64: 1>}, {transform_indices = @transform_7, window_bounds = array<i64: 128, 1>}]} {
    %c0 = arith.constant 0 : index
    %c0_0 = arith.constant 0 : index
    %0 = vector.load %arg1[%c0, %c0_0] : memref<128x128xbf16, #tpu.memory_space<vmem>>, vector<128x128xbf16>
    %c0_1 = arith.constant 0 : index
    %c0_2 = arith.constant 0 : index
    %1 = vector.load %arg2[%c0_1, %c0_2] : memref<128x128xbf16, #tpu.memory_space<vmem>>, vector<128x128xbf16>
    %cst = arith.constant dense<0.000000e+00> : vector<128x128xf32>
    %2 = tpu.matmul %0, %1, %cst {dimension_numbers = #tpu.dot_dimension_numbers<[1], [0], [0], [1], [0, 0, 1, 1], [], []>} : vector<128x128xbf16>, vector<128x128xbf16>, vector<128x128xf32> -> vector<128x128xf32>
    %c0_3 = arith.constant 0 : index
    %c0_4 = arith.constant 0 : index
    %3 = vector.load %arg3[%c0_3, %c0_4] : memref<1x128xf32, #tpu.memory_space<vmem>>, vector<1x128xf32>
    %4 = vector.broadcast %3 : vector<1x128xf32> to vector<128x128xf32>
    %5 = arith.addf %2, %4 : vector<128x128xf32>
    %cst_5 = arith.constant 0.000000e+00 : f32
    %6 = vector.broadcast %cst_5 : f32 to vector<128x128xf32>
    %7 = arith.maximumf %5, %6 : vector<128x128xf32>
    %8 = arith.truncf %7 : vector<128x128xf32> to vector<128x128xbf16>
    %c0_6 = arith.constant 0 : index
    %c0_7 = arith.constant 0 : index
    %9 = vector.load %arg4[%c0_6, %c0_7] : memref<128x128xbf16, #tpu.memory_space<vmem>>, vector<128x128xbf16>
    %cst_8 = arith.constant dense<0.000000e+00> : vector<128x128xf32>
    %10 = tpu.matmul %8, %9, %cst_8 {dimension_numbers = #tpu.dot_dimension_numbers<[1], [0], [0], [1], [0, 0, 1, 1], [], []>} : vector<128x128xbf16>, vector<128x128xbf16>, vector<128x128xf32> -> vector<128x128xf32>
    %c0_9 = arith.constant 0 : index
    %c0_10 = arith.constant 0 : index
    %11 = vector.load %arg5[%c0_9, %c0_10] : memref<1x128xf32, #tpu.memory_space<vmem>>, vector<1x128xf32>
    %12 = vector.broadcast %11 : vector<1x128xf32> to vector<128x128xf32>
    %13 = arith.addf %10, %12 : vector<128x128xf32>
    %cst_11 = arith.constant 0.000000e+00 : f32
    %14 = vector.broadcast %cst_11 : f32 to vector<128x128xf32>
    %15 = arith.maximumf %13, %14 : vector<128x128xf32>
    %c0_12 = arith.constant 0 : index
    %c0_13 = arith.constant 0 : index
    %16 = vector.load %arg6[%c0_12, %c0_13] : memref<1x128xf32, #tpu.memory_space<vmem>>, vector<1x128xf32>
    %17 = vector.broadcast %16 : vector<1x128xf32> to vector<128x128xf32>
    %18 = arith.mulf %15, %17 : vector<128x128xf32>
    %cst_14 = arith.constant dense<0.000000e+00> : vector<128xf32>
    %19 = vector.multi_reduction <add>, %18, %cst_14 [1] : vector<128x128xf32> to vector<128xf32>
    %20 = vector.shape_cast %19 : vector<128xf32> to vector<128x1xf32>
    %c0_15 = arith.constant 0 : index
    %21 = memref.load %arg7[%c0_15] : memref<1xf32, #tpu.memory_space<smem>>
    %22 = vector.broadcast %21 : f32 to vector<128x1xf32>
    %23 = arith.addf %20, %22 : vector<128x1xf32>
    %24 = arith.negf %23 : vector<128x1xf32>
    %25 = math.exp %24 : vector<128x1xf32>
    %cst_16 = arith.constant 1.000000e+00 : f32
    %26 = vector.broadcast %cst_16 : f32 to vector<128x1xf32>
    %27 = arith.addf %26, %25 : vector<128x1xf32>
    %28 = arith.divf %26, %27 : vector<128x1xf32>
    %c0_17 = arith.constant 0 : index
    %c0_18 = arith.constant 0 : index
    %29 = vector.load %arg8[%c0_17, %c0_18] : memref<128x1xf32, #tpu.memory_space<vmem>>, vector<128x1xf32>
    tpu.vector_store %arg8[%c0_17, %c0_18], %28 {strides = array<i32>} : memref<128x1xf32, #tpu.memory_space<vmem>>, vector<128x1xf32>,
    return
  }
  func.func @transform_0(%arg0: i32) -> (i32, i32) {
    %c0_i32 = arith.constant 0 : i32
    %c0_i32_0 = arith.constant 0 : i32
    return %arg0, %c0_i32 : i32, i32
  }
  func.func @transform_1(%arg0: i32) -> (i32, i32) {
    %c0_i32 = arith.constant 0 : i32
    %c0_i32_0 = arith.constant 0 : i32
    %c0_i32_1 = arith.constant 0 : i32
    return %c0_i32, %c0_i32_0 : i32, i32
  }
  func.func @transform_2(%arg0: i32) -> (i32, i32) {
    %c0_i32 = arith.constant 0 : i32
    %c0_i32_0 = arith.constant 0 : i32
    %c0_i32_1 = arith.constant 0 : i32
    return %c0_i32, %c0_i32_0 : i32, i32
  }
  func.func @transform_3(%arg0: i32) -> (i32, i32) {
    %c0_i32 = arith.constant 0 : i32
    %c0_i32_0 = arith.constant 0 : i32
    %c0_i32_1 = arith.constant 0 : i32
    return %c0_i32, %c0_i32_0 : i32, i32
  }
  func.func @transform_4(%arg0: i32) -> (i32, i32) {
    %c0_i32 = arith.constant 0 : i32
    %c0_i32_0 = arith.constant 0 : i32
    %c0_i32_1 = arith.constant 0 : i32
    return %c0_i32, %c0_i32_0 : i32, i32
  }
  func.func @transform_5(%arg0: i32) -> (i32, i32) {
    %c0_i32 = arith.constant 0 : i32
    %c0_i32_0 = arith.constant 0 : i32
    %c0_i32_1 = arith.constant 0 : i32
    return %c0_i32, %c0_i32_0 : i32, i32
  }
  func.func @transform_6(%arg0: i32) -> i32 {
    %c0_i32 = arith.constant 0 : i32
    %c0_i32_0 = arith.constant 0 : i32
    return %c0_i32 : i32
  }
  func.func @transform_7(%arg0: i32) -> (i32, i32) {
    %c0_i32 = arith.constant 0 : i32
    %c0_i32_0 = arith.constant 0 : i32
    return %arg0, %c0_i32 : i32, i32
  }
}

</mosaic_0001>

<bundles_post_ra>
// kernel: tpu_custom_call.1
= control target key start
LH: loop header
LB: loop body
LE: loop exit
PB: predicated region body
PF: predicated region fallthrough
CT: control target
= control target key end

     0   :  { %s1962_s0 = inlined_call_operand.hbm [shape: bf16[384,128], index: 0, kind: input, shape index: {}]   ;;  %s1963_s1 = inlined_call_operand.hbm [shape: bf16[128,128], index: 1, kind: input, shape index: {}]   ;;  %s1964_s2 = inlined_call_operand.vmem [shape: f32[1,128], index: 2, kind: input, shape index: {}]   ;;  %s1965_s3 = inlined_call_operand.hbm [shape: bf16[128,128], index: 3, kind: input, shape index: {}]   ;;  %s1966_s4 = inlined_call_operand.vmem [shape: f32[1,128], index: 4, kind: input, shape index: {}]   ;;  %s1967_s5 = inlined_call_operand.vmem [shape: f32[1,128], index: 5, kind: input, shape index: {}]   ;;  %s1968_s6 = inlined_call_operand.<no memory space> [shape: f32[1], index: 6, kind: input, shape index: {}]   ;;  %s1969_s7 = inlined_call_operand.vmem [shape: f32[384,1], index: 7, kind: output, shape index: {}]  }
   0x1   :  { %12 = sst [smem:[#allocation2]] %s1968_s6 }
   0x2   :  { %13 = vsyncpa [#allocation4], 0 }
   0x3   :  { %15 = vsyncpa [#allocation4 + $0x1], 0 }
   0x4   :  { %16 = vsyncpa [#allocation6], 0  ;;  %s1628_s26 = smov 0   ;;  %s1630_s27 = smov 0  }
   0x5   :  { %s1632_s28 = smov 0   ;;  %s1634_s29 = smov 0  }
   0x6 LB: > { %s1152_s6 = sadd.s32 4294967295, %s1579_s29   ;;  %p42_p0 = scmp.ne.s32.totalorder %s1571_s27, %s1567_s26  ;;  %s1579_s29 = sphi %s1634_s29, %s1986_s29   ;;  %s1575_s28 = sphi %s1632_s28, %s1985_s28   ;;  %s1571_s27 = sphi %s1630_s27, %s1984_s27   ;;  %s1567_s26 = sphi %s1628_s26, %s1983_s26  }
   0x7   : > { %p1650_p1 = scmp.eq.s32.totalorder %s1152_s6, 0  ;;  %p1154_p2 = scmp.ge.s32.totalorder %s1579_s29, 1 }
   0x8   : > { %p205_p3 = scmp.lt.s32.totalorder %s1579_s29, 4  ;;  %s216_s11 = sshll.u32 %s1963_s1, 4  ;;  %s217_s11 = int_to_ptr.hbm [resolvable:$true] %s216_s11 }
   0x9   : > { %p1658_p4 = por %p1650_p1, %p42_p0  ;;  %s1581_s13 = smov [#allocation5]  }
   0xa   : > { %p1665_p5 = pnand %p1154_p2, %p205_p3  ;;  %s218_s14 = sshll.u32 %s1581_s13, 4  ;;  %s219_s14 = int_to_ptr.vmem [resolvable:$true] %s218_s14 }
   0xb   : > { %s233_s17 = sshll.u32 %s1965_s3, 4  ;;  %s1582_s18 = smov 64   ;;  %s234_s17 = int_to_ptr.hbm [resolvable:$true] %s233_s17 }
   0xc   : > { %p1332_p6 = pneg %p1665_p5  ;;  %s1583_s19 = smov 4  }
   0xd   : > { %s1584_s20 = smov [#allocation7]   ;;  %s1683_s22 = sadd.s32 1, %s1579_s29  }
   0xe   : > { %p1333_p7 = pnand %p1332_p6, %p1650_p1  ;;  %s235_s21 = sshll.u32 %s1584_s20, 4  ;;  %s236_s21 = int_to_ptr.vmem [resolvable:$true] %s235_s21 }
   0xf   : > { %s29_s23 = sadd.s32 1, %s1575_s28  ;;  %s26_s24 = ssub.s32 %s1579_s29, %s1683_s22 }
  0x10   : > { %1335 = dma.hbm_to_vmem [thread:$0]  (!%p1333_p7), %s217_s11, 1024, %s219_s14, [#allocation6], %s1582_s18, %s1582_s18, %s1583_s19  }
  0x11   : > { %1338 = dma.hbm_to_vmem [thread:$0]  (!%p1333_p7), %s234_s17, 1024, %s236_s21, [#allocation6], %s1582_s18, %s1582_s18, %s1583_s19  }
  0x12   : > { %p36_p8 = scmp.ne.s32.totalorder %s1575_s28, %s1571_s27  ;;  %p27_p9 = scmp.eq.s32.totalorder %s26_s24, 0 }
  0x13   : > { %p37_p10 = scmp.eq.s32.totalorder %s1579_s29, 0  ;;  %s258_s25 = sand.u32 1, %s1575_s28  }
  0x14   : > { %s1693_s26 = scalar_select %p27_p9, %s1575_s28, %s29_s23  }
  0x15   : > { %p38_p11 = por %p37_p10, %p36_p8  ;;  %p1345_p12 = scmp.lt.s32.totalorder %s1579_s29, 3 }
  0x16   : > { %s1158_s9 = sshll.u32 %s258_s25, 6  ;;  %s1281_s10 = sshll.u32 %s1579_s29, 6 }
  0x17   : > { %s267_s14 = scalar_lea.hbm %s1962_s0, %s1281_s10  ;;  %s262_s16 = scalar_lea.vmem [#allocation3], %s1158_s9 }
  0x18   : > { %s268_s15 = sshll.u32 %s267_s14, 4  ;;  %s270_s17 = sshll.u32 %s262_s16, 4  ;;  %s269_s15 = int_to_ptr.hbm [resolvable:$true] %s268_s15  ;;  %s271_s17 = int_to_ptr.vmem [resolvable:$true] %s270_s17 }
  0x19   : > { %p1700_p13 = pnand %p1345_p12, %p38_p11  ;;  %s259_s21 = scalar_lea.sflag [#allocation4], %s258_s25 }
  0x1a   : > { %s1511_s23 = sshra.s32 %s269_s15, 4  ;;  %s1518_s9 = scalar_lea.hbm %s1962_s0, 192  ;;  %s1512_s23 = int_to_ptr.hbm [resolvable:$true] %s1511_s23 }
  0x1b   : > { %s1513_s24 = scalar_lea.hbm %s1512_s23, 64  ;;  %p1515_p2 = pneg %p1700_p13 }
  0x1c   : > { %p1514_p0 = scmp.ne.s32.totalorder %s1512_s23, %s1513_s24  ;;  %p1519_p7 = scmp.lt.s32.totalorder %s1512_s23, %s1962_s0 }
  0x1d   : > { %p1520_p8 = scmp.lt.s32.totalorder %s1518_s9, %s1513_s24 }
  0x1e   : > { %p1516_p3 = pnand %p1515_p2, %p1514_p0 }
  0x1f   : > { %p1521_p9 = por %p1520_p8, %p1519_p7 }
  0x20   : > { %p1517_p6 = pneg %p1516_p3 }
  0x22   : > { %p1522_p10 = pnand %p1521_p9, %p1517_p6 }
  0x24   : > { %1525 = shalt.err (!%p1522_p10)
}
  0x25   : > { %1342 = dma.hbm_to_vmem [thread:$0]  (!%p1700_p13), %s269_s15, 1024, %s271_s17, %s259_s21, %s1582_s18, %s1582_s18, %s1583_s19  }
  0x26   : > { %282 = sbr.rel (%p1665_p5) target bundleno = 565 (0x235), region = 48  ;;  %s284_s25 = sand.u32 (!%p1665_p5), 1, %s1571_s27  }
  0x27   : > { %s1162_s16 = sshll.u32 (!%p1665_p5), %s284_s25, 6  ;;  %s285_s10 = scalar_lea.sflag (!%p1665_p5), [#allocation4], %s284_s25 }
  0x28   : > { %s1720_s11 = scalar_lea.vmem (!%p1665_p5), [#allocation3], %s1162_s16 }
  0x2b   : > { %1558 = dma.done.wait (%p1658_p4), %s285_s10, 1024  }
  0x2c   : > { %1560 = vsyncadd (%p1658_p4), %s285_s10, 4294966272 }
  0x2d   : > { %1562 = dma.done.wait (%p1650_p1), [#allocation6], 2048  }
  0x2e   : > { %1564 = vsyncadd (%p1650_p1), [#allocation6], 4294965248  ;;  %v1297_v0 = vld [vmem:[#allocation5 + $0x38] sm:$0xff]  ;;  %v1296_v1 = vld [vmem:[#allocation5 + $0x30] sm:$0xff]  ;;  %s727_s17 = sld [smem:[#allocation2]]  ;;  %s1165_s20 = sshll.u32 %s1152_s6, 4 }
  0x2f   : > { %469 = vmatpush.bf16.msra.mxu0 %v1297_v0  ;;  %1306 = vmatpush.bf16.msra.mxu2 %v1297_v0  ;;  %v1295_v2 = vld [vmem:[#allocation5 + $0x28] sm:$0xff]  ;;  %v1294_v3 = vld [vmem:[#allocation5 + $0x20] sm:$0xff]  ;;  %v1293_v4 = vld [vmem:[#allocation5 + $0x18] sm:$0xff]  ;;  %p332_p1 = scmp.lt.s32.totalorder %s1165_s20, 47  ;;  %vm1049_vm2 = vcmask 7168  }
  0x30   : > { %v1292_v5 = vld [vmem:[#allocation5 + $0x10] sm:$0xff]  ;;  %v1291_v6 = vld [vmem:[#allocation5 + $0x8] sm:$0xff]  ;;  %v1290_v7 = vld [vmem:[#allocation5] sm:$0xff] }
  0x31   : > { %v1282_v8 = vld [vmem:[%s1720_s11] sm:$0xff]  ;;  %v1283_v10 = vld [vmem:[%s1720_s11 + $0x8] sm:$0xff]  ;;  %v1305_v12 = vld [vmem:[#allocation7 + $0x38] sm:$0xff]  ;;  %s1988_s20 = smov (!%p332_p1, %s1165_s20), 47 }
  0x32   : > { %v1286_v9 = vld [vmem:[%s1720_s11 + $0x20] sm:$0xff]  ;;  %v1287_v11 = vld [vmem:[%s1720_s11 + $0x28] sm:$0xff]  ;;  %610 = vmatpush.bf16.msra.mxu1 %v1305_v12  ;;  %v1304_v13 = vld [vmem:[#allocation7 + $0x30] sm:$0xff]  ;;  %1314 = vmatpush.bf16.msra.mxu3 %v1305_v12  ;;  %s1166_s29 = sshll.u32 %s1988_s20, 3 }
  0x33   : > { %470 = vmatpush.bf16.msra.mxu0 %v1296_v1  ;;  %1307 = vmatpush.bf16.msra.mxu2 %v1296_v1  ;;  %v1303_v14 = vld [vmem:[#allocation7 + $0x28] sm:$0xff]  ;;  %v1302_v15 = vld [vmem:[#allocation7 + $0x20] sm:$0xff]  ;;  %v1284_v16 = vld [vmem:[%s1720_s11 + $0x10] sm:$0xff]  ;;  %s1799_s23 = scalar_lea.vmem %s1969_s7, %s1166_s29 }
  0x34   : > { %v1288_v17 = vld [vmem:[%s1720_s11 + $0x30] sm:$0xff]  ;;  %v1285_v18 = vld [vmem:[%s1720_s11 + $0x18] sm:$0xff]  ;;  %v1299_v22 = vld [vmem:[#allocation7 + $0x8] sm:$0xff] }
  0x35   : > { %v1289_v19 = vld [vmem:[%s1720_s11 + $0x38] sm:$0xff]  ;;  %v1300_v21 = vld [vmem:[#allocation7 + $0x10] sm:$0xff]  ;;  %v1298_v23 = vld [vmem:[#allocation7] sm:$0xff] }
  0x36   : > { %611 = vmatpush.bf16.msra.mxu1 %v1304_v13  ;;  %1315 = vmatpush.bf16.msra.mxu3 %v1304_v13  ;;  %v1301_v20 = vld [vmem:[#allocation7 + $0x18] sm:$0xff]  ;;  %v1384_v25 = vld [vmem:[%s1964_s2] ss:$0 sm:$0xff] }
  0x37   : > { %471 = vmatpush.bf16.msra.mxu0 %v1295_v2  ;;  %1308 = vmatpush.bf16.msra.mxu2 %v1295_v2 }
  0x3a   : > { %612 = vmatpush.bf16.msra.mxu1 %v1303_v14  ;;  %1316 = vmatpush.bf16.msra.mxu3 %v1303_v14 }
  0x3b   : > { %472 = vmatpush.bf16.msra.mxu0 %v1294_v3  ;;  %1309 = vmatpush.bf16.msra.mxu2 %v1294_v3 }
  0x3e   : > { %613 = vmatpush.bf16.msra.mxu1 %v1302_v15  ;;  %1317 = vmatpush.bf16.msra.mxu3 %v1302_v15 }
  0x3f   : > { %473 = vmatpush.bf16.msra.mxu0 %v1293_v4  ;;  %1310 = vmatpush.bf16.msra.mxu2 %v1293_v4 }
  0x42   : > { %614 = vmatpush.bf16.msra.mxu1 %v1301_v20  ;;  %1318 = vmatpush.bf16.msra.mxu3 %v1301_v20  ;;  %v1750_v20 = vld [vmem:[%s1967_s5] ss:$0 sm:$0xff] }
  0x43   : > { %474 = vmatpush.bf16.msra.mxu0 %v1292_v5  ;;  %1311 = vmatpush.bf16.msra.mxu2 %v1292_v5 }
  0x46   : > { %615 = vmatpush.bf16.msra.mxu1 %v1300_v21  ;;  %1319 = vmatpush.bf16.msra.mxu3 %v1300_v21 }
  0x47   : > { %475 = vmatpush.bf16.msra.mxu0 %v1291_v6  ;;  %1312 = vmatpush.bf16.msra.mxu2 %v1291_v6 }
  0x4a   : > { %616 = vmatpush.bf16.msra.mxu1 %v1299_v22  ;;  %1320 = vmatpush.bf16.msra.mxu3 %v1299_v22 }
  0x4b   : > { %476 = vmatpush.bf16.msra.mxu0 %v1290_v7  ;;  %1313 = vmatpush.bf16.msra.mxu2 %v1290_v7 }
  0x4e   : > { %477 = vmatmul.bf16.vlgmr.msra.gmra.mxu0 %v1282_v8  ;;  %497 = vmatmul.bf16.vlgmr.msra.gmra.mxu2 %v1286_v9 }
  0x4f   : > { %617 = vmatpush.bf16.msra.mxu1 %v1298_v23  ;;  %1321 = vmatpush.bf16.msra.mxu3 %v1298_v23 }
  0x5e   : > { %482 = vmatmul.bf16.gmra.mxu0 %v1283_v10  ;;  %502 = vmatmul.bf16.gmra.mxu2 %v1287_v11 }
  0x6e   : > { %487 = vmatmul.bf16.gmra.mxu0 %v1284_v16  ;;  %507 = vmatmul.bf16.gmra.mxu2 %v1288_v17  ;;  %v1744_v17 = vld [vmem:[%s1966_s4] ss:$0 sm:$0xff] }
  0x7e   : > { %492 = vmatmul.bf16.gmra.mxu0 %v1285_v18  ;;  %512 = vmatmul.bf16.gmra.mxu2 %v1289_v19 }
  0xcb   : > { %v478_v24 = vpop.f32.mrf.mxu0 }
  0xcc   : > { %v479_v27 = vadd.f32 %v1384_v25, %v478_v24 }
  0xce   : > { %v518_v30 = vmax.f32 %v479_v27, 0.0 }
  0xd1   : > { %v498_v26 = vpop.f32.mrf.mxu2 }
  0xd2   : > { %v499_v32 = vadd.f32 %v1384_v25, %v498_v26 }
  0xd3   : > { %v480_v28 = vpop.f32.mrf.mxu0 }
  0xd4   : > { %v481_v29 = vadd.f32 %v1384_v25, %v480_v28  ;;  %v526_v37 = vmax.f32 %v499_v32, 0.0 }
  0xd6   : > { %v519_v31 = vmax.f32 %v481_v29, 0.0 }
  0xd8   : > { %v534_v33 = vpack.c.bf16 %v519_v31, %v518_v30 }
  0xd9   : > { %v500_v34 = vpop.f32.mrf.mxu2 }
  0xda   : > { %v501_v35 = vadd.f32 %v1384_v25, %v500_v34  ;;  %618 = vmatmul.bf16.vlgmr.msra.gmra.mxu1 %v534_v33 }
  0xdb   : > { %v483_v36 = vpop.f32.mrf.mxu0 }
  0xdc   : > { %v527_v38 = vmax.f32 %v501_v35, 0.0  ;;  %v484_v41 = vadd.f32 %v1384_v25, %v483_v36 }
  0xde   : > { %v538_v39 = vpack.c.bf16 %v527_v38, %v526_v37  ;;  %v520_v44 = vmax.f32 %v484_v41, 0.0 }
  0xe0   : > { %638 = vmatmul.bf16.vlgmr.msra.gmra.mxu3 %v538_v39 }
  0xe1   : > { %v503_v40 = vpop.f32.mrf.mxu2 }
  0xe2   : > { %v504_v46 = vadd.f32 %v1384_v25, %v503_v40 }
  0xe3   : > { %v485_v42 = vpop.f32.mrf.mxu0 }
  0xe4   : > { %v486_v43 = vadd.f32 %v1384_v25, %v485_v42  ;;  %v528_v51 = vmax.f32 %v504_v46, 0.0 }
  0xe6   : > { %v521_v45 = vmax.f32 %v486_v43, 0.0 }
  0xe8   : > { %v535_v47 = vpack.c.bf16 %v521_v45, %v520_v44 }
  0xe9   : > { %v505_v48 = vpop.f32.mrf.mxu2 }
  0xea   : > { %v506_v49 = vadd.f32 %v1384_v25, %v505_v48  ;;  %623 = vmatmul.bf16.gmra.mxu1 %v535_v47 }
  0xeb   : > { %v488_v50 = vpop.f32.mrf.mxu0 }
  0xec   : > { %v529_v52 = vmax.f32 %v506_v49, 0.0  ;;  %v489_v55 = vadd.f32 %v1384_v25, %v488_v50 }
  0xee   : > { %v539_v53 = vpack.c.bf16 %v529_v52, %v528_v51  ;;  %v522_v58 = vmax.f32 %v489_v55, 0.0 }
  0xf0   : > { %643 = vmatmul.bf16.gmra.mxu3 %v539_v53 }
  0xf1   : > { %v508_v54 = vpop.f32.mrf.mxu2 }
  0xf2   : > { %v509_v60 = vadd.f32 %v1384_v25, %v508_v54 }
  0xf3   : > { %v490_v56 = vpop.f32.mrf.mxu0 }
  0xf4   : > { %v491_v57 = vadd.f32 %v1384_v25, %v490_v56  ;;  %v530_v1 = vmax.f32 %v509_v60, 0.0 }
  0xf6   : > { %v523_v59 = vmax.f32 %v491_v57, 0.0 }
  0xf8   : > { %v536_v61 = vpack.c.bf16 %v523_v59, %v522_v58 }
  0xf9   : > { %v510_v62 = vpop.f32.mrf.mxu2 }
  0xfa   : > { %v511_v63 = vadd.f32 %v1384_v25, %v510_v62  ;;  %628 = vmatmul.bf16.gmra.mxu1 %v536_v61 }
  0xfb   : > { %v493_v0 = vpop.f32.mrf.mxu0 }
  0xfc   : > { %v531_v2 = vmax.f32 %v511_v63, 0.0  ;;  %v494_v5 = vadd.f32 %v1384_v25, %v493_v0 }
  0xfe   : > { %v540_v3 = vpack.c.bf16 %v531_v2, %v530_v1  ;;  %v524_v8 = vmax.f32 %v494_v5, 0.0 }
 0x100   : > { %648 = vmatmul.bf16.gmra.mxu3 %v540_v3 }
 0x101   : > { %v513_v4 = vpop.f32.mrf.mxu2 }
 0x102   : > { %v514_v10 = vadd.f32 %v1384_v25, %v513_v4 }
 0x103   : > { %v495_v6 = vpop.f32.mrf.mxu0 }
 0x104   : > { %v496_v7 = vadd.f32 %v1384_v25, %v495_v6  ;;  %v532_v14 = vmax.f32 %v514_v10, 0.0 }
 0x106   : > { %v525_v9 = vmax.f32 %v496_v7, 0.0 }
 0x108   : > { %v537_v11 = vpack.c.bf16 %v525_v9, %v524_v8 }
 0x109   : > { %v515_v12 = vpop.f32.mrf.mxu2 }
 0x10a   : > { %v516_v13 = vadd.f32 %v1384_v25, %v515_v12  ;;  %633 = vmatmul.bf16.gmra.mxu1 %v537_v11 }
 0x10c   : > { %v533_v15 = vmax.f32 %v516_v13, 0.0 }
 0x10e   : > { %v541_v16 = vpack.c.bf16 %v533_v15, %v532_v14 }
 0x110   : > { %653 = vmatmul.bf16.gmra.mxu3 %v541_v16 }
 0x157   : > { %v619_v18 = vpop.f32.mrf.mxu1 }
 0x158   : > { %v620_v19 = vadd.f32 %v1744_v17, %v619_v18 }
 0x15a   : > { %v659_v21 = vmax.f32 %v620_v19, 0.0 }
 0x15c   : > { %v679_v22 = vmul.f32 %v1750_v20, %v659_v21  ;;  %v1783_v21 = vstv %s727_s17 }
 0x15e   : > { %695 = vadd.xlane.f32.xlu0 %v679_v22 }
 0x15f   : > { %v621_v23 = vpop.f32.mrf.mxu1 }
 0x160   : > { %v622_v24 = vadd.f32 %v1744_v17, %v621_v23 }
 0x162   : > { %v660_v25 = vmax.f32 %v622_v24, 0.0 }
 0x163   : > { %v639_v26 = vpop.f32.mrf.mxu3 }
 0x164   : > { %v640_v27 = vadd.f32 %v1744_v17, %v639_v26  ;;  %v680_v28 = vmul.f32 %v1750_v20, %v660_v25 }
 0x166   : > { %v667_v29 = vmax.f32 %v640_v27, 0.0  ;;  %697 = vadd.xlane.f32.xlu0 %v680_v28 }
 0x167   : > { %v624_v30 = vpop.f32.mrf.mxu1 }
 0x168   : > { %v625_v31 = vadd.f32 %v1744_v17, %v624_v30  ;;  %v687_v32 = vmul.f32 %v1750_v20, %v667_v29 }
 0x16a   : > { %v661_v33 = vmax.f32 %v625_v31, 0.0  ;;  %711 = vadd.xlane.f32.xlu2 %v687_v32 }
 0x16b   : > { %v641_v34 = vpop.f32.mrf.mxu3 }
 0x16c   : > { %v642_v35 = vadd.f32 %v1744_v17, %v641_v34  ;;  %v681_v36 = vmul.f32 %v1750_v20, %v661_v33 }
 0x16e   : > { %v668_v37 = vmax.f32 %v642_v35, 0.0  ;;  %699 = vadd.xlane.f32.xlu1 %v681_v36 }
 0x16f   : > { %v626_v38 = vpop.f32.mrf.mxu1 }
 0x170   : > { %v627_v39 = vadd.f32 %v1744_v17, %v626_v38  ;;  %v688_v40 = vmul.f32 %v1750_v20, %v668_v37 }
 0x172   : > { %v662_v41 = vmax.f32 %v627_v39, 0.0  ;;  %713 = vadd.xlane.f32.xlu0 %v688_v40 }
 0x173   : > { %v644_v42 = vpop.f32.mrf.mxu3 }
 0x174   : > { %v645_v43 = vadd.f32 %v1744_v17, %v644_v42  ;;  %v682_v44 = vmul.f32 %v1750_v20, %v662_v41 }
 0x176   : > { %701 = vadd.xlane.f32.xlu1 %v682_v44  ;;  %v669_v46 = vmax.f32 %v645_v43, 0.0 }
 0x177   : > { %v629_v45 = vpop.f32.mrf.mxu1 }
 0x178   : > { %v630_v47 = vadd.f32 %v1744_v17, %v629_v45  ;;  %v689_v52 = vmul.f32 %v1750_v20, %v669_v46 }
 0x17a   : > { %v663_v48 = vmax.f32 %v630_v47, 0.0 }
 0x17b   : > { %v646_v49 = vpop.f32.mrf.mxu3 }
 0x17c   : > { %v647_v50 = vadd.f32 %v1744_v17, %v646_v49  ;;  %v683_v51 = vmul.f32 %v1750_v20, %v663_v48 }
 0x17e   : > { %703 = vadd.xlane.f32.xlu2 %v683_v51  ;;  %715 = vadd.xlane.f32.xlu1 %v689_v52  ;;  %v670_v54 = vmax.f32 %v647_v50, 0.0 }
 0x17f   : > { %v631_v53 = vpop.f32.mrf.mxu1 }
 0x180   : > { %v632_v56 = vadd.f32 %v1744_v17, %v631_v53  ;;  %v690_v58 = vmul.f32 %v1750_v20, %v670_v54 }
 0x182   : > { %v664_v61 = vmax.f32 %v632_v56, 0.0 }
 0x183   : > { %v649_v55 = vpop.f32.mrf.mxu3 }
 0x184   : > { %v650_v57 = vadd.f32 %v1744_v17, %v649_v55  ;;  %v684_v2 = vmul.f32 %v1750_v20, %v664_v61 }
 0x186   : > { %v671_v59 = vmax.f32 %v650_v57, 0.0  ;;  %717 = vadd.xlane.f32.xlu2 %v690_v58 }
 0x187   : > { %v634_v60 = vpop.f32.mrf.mxu1 }
 0x188   : > { %v635_v62 = vadd.f32 %v1744_v17, %v634_v60  ;;  %v691_v63 = vmul.f32 %v1750_v20, %v671_v59 }
 0x18a   : > { %719 = vadd.xlane.f32.xlu0 %v691_v63  ;;  %v665_v1 = vmax.f32 %v635_v62, 0.0 }
 0x18b   : > { %v651_v0 = vpop.f32.mrf.mxu3 }
 0x18c   : > { %v685_v5 = vmul.f32 %v1750_v20, %v665_v1  ;;  %v652_v8 = vadd.f32 %v1744_v17, %v651_v0 }
 0x18e   : > { %705 = vadd.xlane.f32.xlu2 %v684_v2  ;;  %v672_v12 = vmax.f32 %v652_v8, 0.0 }
 0x18f   : > { %v636_v3 = vpop.f32.mrf.mxu1 }
 0x190   : > { %v637_v4 = vadd.f32 %v1744_v17, %v636_v3  ;;  %v692_v16 = vmul.f32 %v1750_v20, %v672_v12 }
 0x192   : > { %v666_v6 = vmax.f32 %v637_v4, 0.0  ;;  %707 = vadd.xlane.f32.xlu0 %v685_v5 }
 0x193   : > { %v654_v7 = vpop.f32.mrf.mxu3 }
 0x194   : > { %v655_v9 = vadd.f32 %v1744_v17, %v654_v7  ;;  %v686_v10 = vmul.f32 %v1750_v20, %v666_v6 }
 0x196   : > { %v673_v11 = vmax.f32 %v655_v9, 0.0  ;;  %709 = vadd.xlane.f32.xlu1 %v686_v10 }
 0x198   : > { %v693_v13 = vmul.f32 %v1750_v20, %v673_v11 }
 0x19a   : > { %723 = vadd.xlane.f32.xlu2 %v693_v13 }
 0x19b   : > { %v656_v14 = vpop.f32.mrf.mxu3 }
 0x19c   : > { %v657_v15 = vadd.f32 %v1744_v17, %v656_v14 }
 0x19e   : > { %v674_v18 = vmax.f32 %v657_v15, 0.0  ;;  %721 = vadd.xlane.f32.xlu1 %v692_v16 }
 0x1a0   : > { %v694_v19 = vmul.f32 %v1750_v20, %v674_v18 }
 0x1a2   : > { %725 = vadd.xlane.f32.xlu0 %v694_v19 }
 0x1d1   : > { %v696_v22 = vpop.xlane.xlu0 %695 }
 0x1d2   : > { %v729_v23 = vadd.f32 %v1783_v21, %v696_v22 }
 0x1d4   : > { %v1263_v24 = vmul.f32 -1.442695, %v729_v23 }
 0x1d6   : > { %1387 = vpow2.f32 %v1263_v24 }
 0x1d9   : > { %v698_v25 = vpop.xlane.xlu0 %697 }
 0x1da   : > { %v730_v26 = vadd.f32 %v1783_v21, %v698_v25 }
 0x1dc   : > { %v1388_v17 = vpop.eup %1387  ;;  %v1264_v27 = vmul.f32 -1.442695, %v730_v26 }
 0x1dd   : > { %v793_v28 = vadd.f32 1.0, %v1388_v17  ;;  %v712_v29 = vpop.xlane.xlu2 %711 }
 0x1de   : > { %1389 = vpow2.f32 %v1264_v27  ;;  %v737_v20 = vadd.f32 %v1783_v21, %v712_v29 }
 0x1df   : > { %1391 = vrcp.f32 %v793_v28  ;;  %v818_v43 = vand.u32 2147483647, %v793_v28  ;;  %v820_v44 = vand.u32 2147483648, %v793_v28  ;;  %vm814_vm1 = vweird.f32 %v793_v28 }
 0x1e0   : > { %v1271_v30 = vmul.f32 -1.442695, %v737_v20 }
 0x1e1   : > { %v700_v31 = vpop.xlane.xlu1 %699  ;;  %v821_v53 = vor.u32 1.1754944e-38, %v820_v44  ;;  %vm819_vm4 = vcmp.eq.f32.partialorder %v818_v43, 8.507059e+37 }
 0x1e2   : > { %1393 = vpow2.f32 %v1271_v30  ;;  %v731_v32 = vadd.f32 %v1783_v21, %v700_v31 }
 0x1e4   : > { %v1390_v33 = vpop.eup %1389  ;;  %v1265_v34 = vmul.f32 -1.442695, %v731_v32 }
 0x1e5   : > { %v1392_v35 = vpop.eup %1391  ;;  %v794_v36 = vadd.f32 1.0, %v1390_v33  ;;  %v714_v37 = vpop.xlane.xlu0 %713 }
 0x1e6   : > { %v810_v38 = vmul.f32 %v1392_v35, %v793_v28  ;;  %1395 = vpow2.f32 %v1265_v34  ;;  %v738_v39 = vadd.f32 %v1783_v21, %v714_v37  ;;  %vm815_vm0 = vweird.f32 %v1392_v35 }
 0x1e7   : > { %1397 = vrcp.f32 %v794_v36  ;;  %vm816_vm3 = vmor %vm814_vm1, %vm815_vm0  ;;  %v833_v58 = vand.u32 2147483647, %v794_v36  ;;  %v835_v62 = vand.u32 2147483648, %v794_v36  ;;  %vm829_vm6 = vweird.f32 %v794_v36 }
 0x1e8   : > { %v1394_v40 = vpop.eup %1393  ;;  %v811_v41 = vsub.f32 1.0, %v810_v38  ;;  %v1272_v42 = vmul.f32 -1.442695, %v738_v39 }
 0x1e9   : > { %v1792_v45 = vadd.f32 1.0, %v1394_v40  ;;  %v702_v46 = vpop.xlane.xlu1 %701  ;;  %vm1809_vm7 = vcmp.eq.f32.partialorder %v833_v58, 8.507059e+37  ;;  %v836_v11 = vor.u32 1.1754944e-38, %v835_v62 }
 0x1ea   : > { %v812_v47 = vmul.f32 %v1392_v35, %v811_v41  ;;  %1399 = vpow2.f32 %v1272_v42  ;;  %v732_v48 = vadd.f32 %v1783_v21, %v702_v46 }
 0x1eb   : > { %1401 = vrcp.f32 %v1792_v45  ;;  %v938_v8 = vand.u32 2147483647, %v1792_v45  ;;  %v940_v12 = vand.u32 2147483648, %v1792_v45  ;;  %vm934_vm10 = vweird.f32 %v1792_v45 }
 0x1ec   : > { %v1396_v49 = vpop.eup %1395  ;;  %v813_v50 = vadd.f32 %v1392_v35, %v812_v47  ;;  %v1266_v51 = vmul.f32 -1.442695, %v732_v48 }
 0x1ed   : > { %v1398_v52 = vpop.eup %1397  ;;  %v1801_v54 = vadd.f32 1.0, %v1396_v49  ;;  %vm939_vm11 = vcmp.eq.f32.partialorder %v938_v8, 8.507059e+37  ;;  %v941_v26 = vor.u32 1.1754944e-38, %v940_v12 }
 0x1ee   : > { %v817_v55 = vsel %vm816_vm3, %v1392_v35, %v813_v50  ;;  %v825_v56 = vmul.f32 %v1398_v52, %v794_v36  ;;  %1403 = vpow2.f32 %v1266_v51  ;;  %vm830_vm5 = vweird.f32 %v1398_v52 }
 0x1ef   : > { %v822_v57 = vsel %vm819_vm4, %v821_v53, %v817_v55  ;;  %1405 = vrcp.f32 %v1801_v54  ;;  %vm831_vm8 = vmor %vm829_vm6, %vm830_vm5  ;;  %v848_v17 = vand.u32 2147483647, %v1801_v54  ;;  %v850_v27 = vand.u32 2147483648, %v1801_v54 }
 0x1f0   : > { %v1400_v59 = vpop.eup %1399  ;;  %1050 = vst.msk [vmem:[%s1799_s23] sm:$0xff] %vm1049_vm2, %v822_v57  ;;  %v826_v60 = vsub.f32 1.0, %v825_v56  ;;  %vm844_vm14 = vweird.f32 %v1801_v54 }
 0x1f1   : > { %v1402_v61 = vpop.eup %1401  ;;  %v1806_v63 = vadd.f32 1.0, %v1400_v59  ;;  %v704_v0 = vpop.xlane.xlu2 %703  ;;  %vm849_vm0 = vcmp.eq.f32.partialorder %v848_v17, 8.507059e+37  ;;  %v851_v38 = vor.u32 1.1754944e-38, %v850_v27 }
 0x1f2   : > { %v827_v1 = vmul.f32 %v1398_v52, %v826_v60  ;;  %v930_v2 = vmul.f32 %v1402_v61, %v1792_v45  ;;  %v716_v3 = vpop.xlane.xlu1 %715  ;;  %v733_v9 = vadd.f32 %v1783_v21, %v704_v0  ;;  %vm935_vm9 = vweird.f32 %v1402_v61 }
 0x1f3   : > { %1407 = vrcp.f32 %v1806_v63  ;;  %v739_v14 = vadd.f32 %v1783_v21, %v716_v3  ;;  %vm936_vm12 = vmor %vm934_vm10, %vm935_vm9  ;;  %v953_v36 = vand.u32 2147483647, %v1806_v63  ;;  %v955_v39 = vand.u32 2147483648, %v1806_v63 }
 0x1f4   : > { %v1404_v5 = vpop.eup %1403  ;;  %v828_v6 = vadd.f32 %v1398_v52, %v827_v1  ;;  %v931_v7 = vsub.f32 1.0, %v930_v2  ;;  %v1267_v24 = vmul.f32 -1.442695, %v733_v9  ;;  %vm949_vm3 = vweird.f32 %v1806_v63 }
 0x1f5   : > { %v1406_v10 = vpop.eup %1405  ;;  %v1817_v13 = vadd.f32 1.0, %v1404_v5  ;;  %v1273_v28 = vmul.f32 -1.442695, %v739_v14  ;;  %vm954_vm4 = vcmp.eq.f32.partialorder %v953_v36, 8.507059e+37  ;;  %v956_v50 = vor.u32 1.1754944e-38, %v955_v39 }
 0x1f6   : > { %v832_v15 = vsel %vm831_vm8, %v1398_v52, %v828_v6  ;;  %v932_v16 = vmul.f32 %v1402_v61, %v931_v7  ;;  %v840_v18 = vmul.f32 %v1406_v10, %v1801_v54  ;;  %vm845_vm13 = vweird.f32 %v1406_v10 }
 0x1f7   : > { %v837_v19 = vsel %vm1809_vm7, %v836_v11, %v832_v15  ;;  %1409 = vrcp.f32 %v1817_v13  ;;  %vm846_vm15 = vmor %vm844_vm14, %vm845_vm13  ;;  %v863_v51 = vand.u32 2147483647, %v1817_v13  ;;  %v865_v52 = vand.u32 2147483648, %v1817_v13 }
 0x1f8   : > { %1051 = vst.msk [vmem:[%s1799_s23 + $0x8] sm:$0xff] %vm1049_vm2, %v837_v19  ;;  %v933_v22 = vadd.f32 %v1402_v61, %v932_v16  ;;  %v841_v23 = vsub.f32 1.0, %v840_v18  ;;  %1411 = vpow2.f32 %v1267_v24  ;;  %vm859_vm7 = vweird.f32 %v1817_v13 }
 0x1f9   : > { %v1408_v25 = vpop.eup %1407  ;;  %v718_v29 = vpop.xlane.xlu2 %717  ;;  %1413 = vpow2.f32 %v1273_v28  ;;  %v866_v0 = vor.u32 1.1754944e-38, %v865_v52  ;;  %vm864_vm9 = vcmp.eq.f32.partialorder %v863_v51, 8.507059e+37 }
 0x1fa   : > { %v937_v20 = vsel %vm936_vm12, %v1402_v61, %v933_v22  ;;  %v842_v30 = vmul.f32 %v1406_v10, %v841_v23  ;;  %v945_v31 = vmul.f32 %v1408_v25, %v1806_v63  ;;  %v740_v33 = vadd.f32 %v1783_v21, %v718_v29 }
 0x1fb   : > { %v942_v32 = vsel %vm939_vm11, %v941_v26, %v937_v20  ;;  %vm950_vm1 = vweird.f32 %v1408_v25 }
 0x1fc   : > { %1058 = vst.msk [vmem:[%s1799_s23 + $0x40] sm:$0xff] %vm1049_vm2, %v942_v32  ;;  %v843_v34 = vadd.f32 %v1406_v10, %v842_v30  ;;  %v946_v35 = vsub.f32 1.0, %v945_v31  ;;  %v1274_v40 = vmul.f32 -1.442695, %v740_v33  ;;  %vm951_vm5 = vmor %vm949_vm3, %vm950_vm1 }
 0x1fd   : > { %v1410_v37 = vpop.eup %1409  ;;  %v720_v41 = vpop.xlane.xlu0 %719 }
 0x1fe   : > { %v847_v42 = vsel %vm846_vm15, %v1406_v10, %v843_v34  ;;  %v947_v43 = vmul.f32 %v1408_v25, %v946_v35  ;;  %v855_v44 = vmul.f32 %v1410_v37, %v1817_v13  ;;  %1415 = vpow2.f32 %v1274_v40  ;;  %v1412_v49 = vpop.eup %1411 }
 0x1ff   : > { %v852_v45 = vsel %vm849_vm0, %v851_v38, %v847_v42  ;;  %v741_v46 = vadd.f32 %v1783_v21, %v720_v41  ;;  %v1414_v55 = vpop.eup %1413  ;;  %vm860_vm6 = vweird.f32 %v1410_v37  ;;  %v1843_v58 = vadd.f32 1.0, %v1412_v49 }
 0x200   : > { %1052 = vst.msk [vmem:[%s1799_s23 + $0x10] sm:$0xff] %vm1049_vm2, %v852_v45  ;;  %v948_v47 = vadd.f32 %v1408_v25, %v947_v43  ;;  %v856_v48 = vsub.f32 1.0, %v855_v44  ;;  %v1845_v60 = vadd.f32 1.0, %v1414_v55  ;;  %vm861_vm8 = vmor %vm859_vm7, %vm860_vm6 }
 0x201   : > { %v1275_v53 = vmul.f32 -1.442695, %v741_v46  ;;  %v706_v54 = vpop.xlane.xlu2 %705  ;;  %v878_v6 = vand.u32 2147483647, %v1843_v58  ;;  %v880_v8 = vand.u32 2147483648, %v1843_v58  ;;  %vm874_vm10 = vweird.f32 %v1843_v58 }
 0x202   : > { %v952_v56 = vsel %vm951_vm5, %v1408_v25, %v948_v47  ;;  %v857_v57 = vmul.f32 %v1410_v37, %v856_v48  ;;  %v734_v61 = vadd.f32 %v1783_v21, %v706_v54  ;;  %vm964_vm11 = vweird.f32 %v1845_v60 }
 0x203   : > { %v957_v59 = vsel %vm954_vm4, %v956_v50, %v952_v56  ;;  %1417 = vpow2.f32 %v1275_v53  ;;  %vm1867_vm12 = vcmp.eq.f32.partialorder %v878_v6, 8.507059e+37  ;;  %v968_v22 = vand.u32 2147483647, %v1845_v60 }
 0x204   : > { %1059 = vst.msk [vmem:[%s1799_s23 + $0x48] sm:$0xff] %vm1049_vm2, %v957_v59  ;;  %v858_v62 = vadd.f32 %v1410_v37, %v857_v57  ;;  %1419 = vrcp.f32 %v1843_v58  ;;  %v1416_v63 = vpop.eup %1415  ;;  %v1268_v5 = vmul.f32 -1.442695, %v734_v61  ;;  %v881_v24 = vor.u32 1.1754944e-38, %v880_v8 }
 0x205   : > { %1421 = vrcp.f32 %v1845_v60  ;;  %v1853_v2 = vadd.f32 1.0, %v1416_v63  ;;  %v708_v3 = vpop.xlane.xlu0 %707  ;;  %v970_v25 = vand.u32 2147483648, %v1845_v60  ;;  %vm1881_vm15 = vcmp.eq.f32.partialorder %v968_v22, 8.507059e+37 }
 0x206   : > { %v862_v1 = vsel %vm861_vm8, %v1410_v37, %v858_v62  ;;  %v735_v9 = vadd.f32 %v1783_v21, %v708_v3 }
 0x207   : > { %v867_v4 = vsel %vm864_vm9, %v866_v0, %v862_v1  ;;  %1423 = vrcp.f32 %v1853_v2  ;;  %v983_v28 = vand.u32 2147483647, %v1853_v2  ;;  %v985_v33 = vand.u32 2147483648, %v1853_v2 }
 0x208   : > { %1053 = vst.msk [vmem:[%s1799_s23 + $0x18] sm:$0xff] %vm1049_vm2, %v867_v4  ;;  %1425 = vpow2.f32 %v1268_v5  ;;  %v1269_v16 = vmul.f32 -1.442695, %v735_v9  ;;  %v971_v38 = vor.u32 1.1754944e-38, %v970_v25  ;;  %vm979_vm1 = vweird.f32 %v1853_v2 }
 0x209   : > { %v1418_v7 = vpop.eup %1417  ;;  %v710_v10 = vpop.xlane.xlu1 %709  ;;  %vm1895_vm5 = vcmp.eq.f32.partialorder %v983_v28, 8.507059e+37  ;;  %v986_v51 = vor.u32 1.1754944e-38, %v985_v33 }
 0x20a   : > { %v1420_v11 = vpop.eup %1419  ;;  %v1861_v12 = vadd.f32 1.0, %v1418_v7  ;;  %v736_v13 = vadd.f32 %v1783_v21, %v710_v10 }
 0x20b   : > { %v1422_v14 = vpop.eup %1421  ;;  %v870_v15 = vmul.f32 %v1420_v11, %v1843_v58  ;;  %vm875_vm13 = vweird.f32 %v1420_v11 }
 0x20c   : > { %v960_v19 = vmul.f32 %v1422_v14, %v1845_v60  ;;  %1427 = vrcp.f32 %v1861_v12  ;;  %v1270_v29 = vmul.f32 -1.442695, %v736_v13  ;;  %vm965_vm14 = vweird.f32 %v1422_v14  ;;  %vm876_vm0 = vmor %vm874_vm10, %vm875_vm13 }
 0x20d   : > { %v871_v23 = vsub.f32 1.0, %v870_v15  ;;  %1429 = vpow2.f32 %v1269_v16  ;;  %v724_v26 = vpop.xlane.xlu2 %723  ;;  %v1424_v17 = vpop.eup %1423  ;;  %vm966_vm3 = vmor %vm964_vm11, %vm965_vm14  ;;  %v998_v58 = vand.u32 2147483647, %v1861_v12  ;;  %v1000_v59 = vand.u32 2147483648, %v1861_v12 }
 0x20e   : > { %v961_v27 = vsub.f32 1.0, %v960_v19  ;;  %v743_v20 = vadd.f32 %v1783_v21, %v724_v26  ;;  %v1426_v30 = vpop.eup %1425  ;;  %v975_v32 = vmul.f32 %v1424_v17, %v1853_v2  ;;  %1431 = vpow2.f32 %v1270_v29 }
 0x20f   : > { %v872_v31 = vmul.f32 %v1420_v11, %v871_v23  ;;  %v1879_v35 = vadd.f32 1.0, %v1426_v30  ;;  %vm980_vm4 = vweird.f32 %v1424_v17  ;;  %vm994_vm8 = vweird.f32 %v1861_v12 }
 0x210   : > { %v962_v34 = vmul.f32 %v1422_v14, %v961_v27  ;;  %v976_v39 = vsub.f32 1.0, %v975_v32  ;;  %v1277_v42 = vmul.f32 -1.442695, %v743_v20  ;;  %vm981_vm6 = vmor %vm979_vm1, %vm980_vm4  ;;  %v1001_v6 = vor.u32 1.1754944e-38, %v1000_v59 }
 0x211   : > { %v873_v36 = vadd.f32 %v1420_v11, %v872_v31  ;;  %1433 = vrcp.f32 %v1879_v35  ;;  %v722_v47 = vpop.xlane.xlu1 %721  ;;  %vm999_vm10 = vcmp.eq.f32.partialorder %v998_v58, 8.507059e+37 }
 0x212   : > { %v1428_v40 = vpop.eup %1427  ;;  %v963_v41 = vadd.f32 %v1422_v14, %v962_v34  ;;  %v977_v45 = vmul.f32 %v1424_v17, %v976_v39  ;;  %1435 = vpow2.f32 %v1277_v42  ;;  %v742_v60 = vadd.f32 %v1783_v21, %v722_v47 }
 0x213   : > { %v1430_v43 = vpop.eup %1429  ;;  %v877_v44 = vsel %vm876_vm0, %v1420_v11, %v873_v36  ;;  %v990_v46 = vmul.f32 %v1428_v40, %v1861_v12  ;;  %vm995_vm7 = vweird.f32 %v1428_v40 }
 0x214   : > { %v882_v48 = vsel %vm1867_vm12, %v881_v24, %v877_v44  ;;  %v967_v49 = vsel %vm966_vm3, %v1422_v14, %v963_v41  ;;  %v978_v53 = vadd.f32 %v1424_v17, %v977_v45  ;;  %v1903_v55 = vadd.f32 1.0, %v1430_v43  ;;  %v1432_v57 = vpop.eup %1431  ;;  %vm996_vm9 = vmor %vm994_vm8, %vm995_vm7 }
 0x215   : > { %1054 = vst.msk [vmem:[%s1799_s23 + $0x20] sm:$0xff] %vm1049_vm2, %v882_v48  ;;  %v972_v52 = vsel %vm1881_vm15, %v971_v38, %v967_v49  ;;  %v991_v54 = vsub.f32 1.0, %v990_v46  ;;  %v726_v56 = vpop.xlane.xlu0 %725  ;;  %v1916_v1 = vadd.f32 1.0, %v1432_v57  ;;  %v1276_v5 = vmul.f32 -1.442695, %v742_v60 }
 0x216   : > { %1060 = vst.msk [vmem:[%s1799_s23 + $0x50] sm:$0xff] %vm1049_vm2, %v972_v52  ;;  %v982_v61 = vsel %vm981_vm6, %v1424_v17, %v978_v53  ;;  %1437 = vrcp.f32 %v1903_v55  ;;  %v744_v2 = vadd.f32 %v1783_v21, %v726_v56  ;;  %v895_v21 = vand.u32 2147483648, %v1879_v35 }
 0x217   : > { %v992_v62 = vmul.f32 %v1428_v40, %v991_v54  ;;  %v1434_v63 = vpop.eup %1433  ;;  %v987_v0 = vsel %vm1895_vm5, %v986_v51, %v982_v61  ;;  %1439 = vrcp.f32 %v1916_v1  ;;  %v893_v14 = vand.u32 2147483647, %v1879_v35 }
 0x218   : > { %1061 = vst.msk [vmem:[%s1799_s23 + $0x58] sm:$0xff] %vm1049_vm2, %v987_v0  ;;  %v885_v4 = vmul.f32 %v1434_v63, %v1879_v35  ;;  %v1436_v9 = vpop.eup %1435  ;;  %1441 = vpow2.f32 %v1276_v5  ;;  %v1278_v11 = vmul.f32 -1.442695, %v744_v2  ;;  %vm890_vm11 = vweird.f32 %v1434_v63 }
 0x219   : > { %v993_v3 = vadd.f32 %v1428_v40, %v992_v62  ;;  %v807_v15 = vadd.f32 1.0, %v1436_v9  ;;  %vm889_vm12 = vweird.f32 %v1879_v35  ;;  %v896_v22 = vor.u32 1.1754944e-38, %v895_v21 }
 0x21a   : > { %v886_v8 = vsub.f32 1.0, %v885_v4  ;;  %1443 = vpow2.f32 %v1278_v11  ;;  %vm891_vm13 = vmor %vm889_vm12, %vm890_vm11  ;;  %v910_v24 = vand.u32 2147483648, %v1903_v55  ;;  %vm894_vm14 = vcmp.eq.f32.partialorder %v893_v14, 8.507059e+37 }
 0x21b   : > { %v997_v7 = vsel %vm996_vm9, %v1428_v40, %v993_v3  ;;  %1445 = vrcp.f32 %v807_v15  ;;  %v908_v29 = vand.u32 2147483647, %v1903_v55  ;;  %vm904_vm0 = vweird.f32 %v1903_v55 }
 0x21c   : > { %v1002_v10 = vsel %vm999_vm10, %v1001_v6, %v997_v7  ;;  %v1438_v13 = vpop.eup %1437  ;;  %v887_v12 = vmul.f32 %v1434_v63, %v886_v8  ;;  %v911_v33 = vor.u32 1.1754944e-38, %v910_v24  ;;  %v925_v34 = vand.u32 2147483648, %v1916_v1 }
 0x21d   : > { %1062 = vst.msk [vmem:[%s1799_s23 + $0x60] sm:$0xff] %vm1049_vm2, %v1002_v10  ;;  %v900_v16 = vmul.f32 %v1438_v13, %v1903_v55  ;;  %v1440_v19 = vpop.eup %1439  ;;  %vm905_vm15 = vweird.f32 %v1438_v13  ;;  %v923_v37 = vand.u32 2147483647, %v1916_v1  ;;  %vm909_vm4 = vcmp.eq.f32.partialorder %v908_v29, 8.507059e+37 }
 0x21e   : > { %v888_v18 = vadd.f32 %v1434_v63, %v887_v12  ;;  %v915_v26 = vmul.f32 %v1440_v19, %v1916_v1  ;;  %v1442_v17 = vpop.eup %1441  ;;  %vm906_vm1 = vmor %vm904_vm0, %vm905_vm15  ;;  %vm920_vm3 = vweird.f32 %v1440_v19  ;;  %vm919_vm5 = vweird.f32 %v1916_v1 }
 0x21f   : > { %v901_v23 = vsub.f32 1.0, %v900_v16  ;;  %v806_v30 = vadd.f32 1.0, %v1442_v17  ;;  %vm921_vm6 = vmor %vm919_vm5, %vm920_vm3  ;;  %v926_v43 = vor.u32 1.1754944e-38, %v925_v34  ;;  %vm924_vm7 = vcmp.eq.f32.partialorder %v923_v37, 8.507059e+37 }
 0x220   : > { %v892_v25 = vsel %vm891_vm13, %v1434_v63, %v888_v18  ;;  %v916_v20 = vsub.f32 1.0, %v915_v26  ;;  %v1444_v31 = vpop.eup %1443  ;;  %v1030_v46 = vand.u32 2147483648, %v807_v15  ;;  %v1028_v49 = vand.u32 2147483647, %v807_v15 }
 0x221   : > { %v897_v27 = vsel %vm894_vm14, %v896_v22, %v892_v25  ;;  %v902_v28 = vmul.f32 %v1438_v13, %v901_v23  ;;  %v1446_v35 = vpop.eup %1445  ;;  %1447 = vrcp.f32 %v806_v30  ;;  %v808_v42 = vadd.f32 1.0, %v1444_v31 }
 0x222   : > { %1055 = vst.msk [vmem:[%s1799_s23 + $0x28] sm:$0xff] %vm1049_vm2, %v897_v27  ;;  %v917_v36 = vmul.f32 %v1440_v19, %v916_v20  ;;  %v1020_v39 = vmul.f32 %v1446_v35, %v807_v15  ;;  %vm1025_vm8 = vweird.f32 %v1446_v35  ;;  %vm1024_vm9 = vweird.f32 %v807_v15 }
 0x223   : > { %v903_v32 = vadd.f32 %v1438_v13, %v902_v28  ;;  %1449 = vrcp.f32 %v808_v42  ;;  %vm1026_vm10 = vmor %vm1024_vm9, %vm1025_vm8  ;;  %v1031_v53 = vor.u32 1.1754944e-38, %v1030_v46  ;;  %vm1029_vm11 = vcmp.eq.f32.partialorder %v1028_v49, 8.507059e+37 }
 0x224   : > { %v918_v41 = vadd.f32 %v1440_v19, %v917_v36  ;;  %v1021_v44 = vsub.f32 1.0, %v1020_v39  ;;  %v1013_v58 = vand.u32 2147483647, %v806_v30  ;;  %v1015_v59 = vand.u32 2147483648, %v806_v30 }
 0x225   : > { %v907_v38 = vsel %vm906_vm1, %v1438_v13, %v903_v32  ;;  %vm1009_vm13 = vweird.f32 %v806_v30  ;;  %v1045_v1 = vand.u32 2147483648, %v808_v42  ;;  %v1043_v4 = vand.u32 2147483647, %v808_v42 }
 0x226   : > { %v912_v40 = vsel %vm909_vm4, %v911_v33, %v907_v38  ;;  %v922_v45 = vsel %vm921_vm6, %v1440_v19, %v918_v41  ;;  %v1022_v48 = vmul.f32 %v1446_v35, %v1021_v44  ;;  %vm1014_vm15 = vcmp.eq.f32.partialorder %v1013_v58, 8.507059e+37 }
 0x227   : > { %1056 = vst.msk [vmem:[%s1799_s23 + $0x30] sm:$0xff] %vm1049_vm2, %v912_v40  ;;  %v927_v47 = vsel %vm924_vm7, %v926_v43, %v922_v45  ;;  %v1448_v50 = vpop.eup %1447  ;;  %v1016_v0 = vor.u32 1.1754944e-38, %v1015_v59  ;;  %vm1039_vm1 = vweird.f32 %v808_v42  ;;  %v1046_v7 = vor.u32 1.1754944e-38, %v1045_v1 }
 0x228   : > { %1057 = vst.msk [vmem:[%s1799_s23 + $0x38] sm:$0xff] %vm1049_vm2, %v927_v47  ;;  %v1023_v51 = vadd.f32 %v1446_v35, %v1022_v48  ;;  %v1005_v52 = vmul.f32 %v1448_v50, %v806_v30  ;;  %vm1010_vm12 = vweird.f32 %v1448_v50  ;;  %vm1044_vm4 = vcmp.eq.f32.partialorder %v1043_v4, 8.507059e+37 }
 0x229   : > { %v1450_v56 = vpop.eup %1449  ;;  %vm1011_vm14 = vmor %vm1009_vm13, %vm1010_vm12 }
 0x22a   : > { %v1027_v54 = vsel %vm1026_vm10, %v1446_v35, %v1023_v51  ;;  %v1006_v55 = vsub.f32 1.0, %v1005_v52  ;;  %v1035_v61 = vmul.f32 %v1450_v56, %v808_v42  ;;  %vm1040_vm0 = vweird.f32 %v1450_v56 }
 0x22b   : > { %v1032_v57 = vsel %vm1029_vm11, %v1031_v53, %v1027_v54  ;;  %vm1041_vm3 = vmor %vm1039_vm1, %vm1040_vm0 }
 0x22c   : > { %1064 = vst.msk [vmem:[%s1799_s23 + $0x70] sm:$0xff] %vm1049_vm2, %v1032_v57  ;;  %v1007_v60 = vmul.f32 %v1448_v50, %v1006_v55  ;;  %v1036_v63 = vsub.f32 1.0, %v1035_v61 }
 0x22e   : > { %v1008_v62 = vadd.f32 %v1448_v50, %v1007_v60  ;;  %v1037_v3 = vmul.f32 %v1450_v56, %v1036_v63 }
 0x230   : > { %v1012_v2 = vsel %vm1011_vm14, %v1448_v50, %v1008_v62  ;;  %v1038_v6 = vadd.f32 %v1450_v56, %v1037_v3 }
 0x231   : > { %v1017_v5 = vsel %vm1014_vm15, %v1016_v0, %v1012_v2 }
 0x232   : > { %1063 = vst.msk [vmem:[%s1799_s23 + $0x68] sm:$0xff] %vm1049_vm2, %v1017_v5  ;;  %v1042_v8 = vsel %vm1041_vm3, %v1450_v56, %v1038_v6 }
 0x233   : > { %v1047_v9 = vsel %vm1044_vm4, %v1046_v7, %v1042_v8 }
 0x234   : > { %1065 = vst.msk [vmem:[%s1799_s23 + $0x78] sm:$0xff] %vm1049_vm2, %v1047_v9 }
 0x235 PF: > { %s1982_s24 = smov %s1693_s26  ;;  %p19_p4 = scmp.ge.s32.totalorder %s1683_s22, 5  }
 0x236   : > { %s1983_s26 = smov %s1571_s27  ;;  %s1984_s27 = smov %s1575_s28 }
 0x237   : > { %s1985_s28 = smov %s1982_s24  ;;  %s1986_s29 = smov %s1683_s22 }
 0x238   :  { %21 = sbr.rel (!%p19_p4) target bundleno = 6 (0x6), region = 96 }
 0x23d   :  { %1088 = vsyncpa [#allocation4], 1 }
 0x23e   :  { %1090 = vsyncpa [#allocation4 + $0x1], 1 }
 0x23f   :  { %1091 = vsyncpa [#allocation6], 1 }

</bundles_post_ra>
